<compile_context>
chip_gen: v5e
topology: v5e:2x2
jax: 0.10.0
libtpu: 0.0.40
codegen_flags: <defaults>
</compile_context>

<pallas_src>
import functools

import jax
import jax.numpy as jnp
from jax.experimental import pallas as pl
from jax.experimental.pallas import tpu as pltpu

_LANES = 512                      # lane-dense slab: last dim = 4 x 128-lane vreg
_SUBLANES = 8
_VMEM_LIMIT = 32 * 1024 * 1024    # explicit headroom (safe on v5e/v6e/v7x)


def _round_up(x, m):
    return ((x + m - 1) // m) * m


def _pow_gamma(x, gamma):
    g = float(gamma)
    if g.is_integer() and g >= 0:
        return jax.lax.integer_pow(x, int(g))   # VPU multiplies, no EUP pow
    return x ** g                               # general (non-integer) gamma


def _focal_elementwise(p, t, *, alpha, gamma, logits, binary_targets):
    """Per-element focal loss in f32 (matches torch semantics)."""
    p = p.astype(jnp.float32)
    t = t.astype(jnp.float32)
    if logits:
        # binary_cross_entropy_with_logits (numerically stable form)
        x = p
        bce = jnp.maximum(x, 0.0) - x * t + jnp.log1p(jnp.exp(-jnp.abs(x)))
        one_minus_pt = 1.0 - jnp.exp(-bce)
    elif binary_targets:
        # Fast path for t in {0,1}: pt = p if t==1 else (1-p).
        # Exactly 1 log / element, no exp (saves 2 EUP ops vs. the general path).
        pt = t * p + (1.0 - t) * (1.0 - p)
        bce = -jnp.maximum(jnp.log(pt), -100.0)          # torch log clamp
        one_minus_pt = 1.0 - pt
    else:
        # binary_cross_entropy on probabilities; torch clamps log terms at -100
        logp = jnp.maximum(jnp.log(p), -100.0)
        log1mp = jnp.maximum(jnp.log(1.0 - p), -100.0)
        bce = -(t * logp + (1.0 - t) * log1mp)
        one_minus_pt = 1.0 - jnp.exp(-bce)
    return alpha * _pow_gamma(one_minus_pt, gamma) * bce


def _focal_sum_kernel(p_ref, t_ref, out_ref, *, alpha, gamma, logits,
                      binary_targets):
    """Partial-sum kernel: resident (1, 8, LANES) output block accumulates
    vreg-shaped VPU partials; no per-step cross-lane reduce."""
    j = pl.program_id(1)

    @pl.when(j == 0)
    def _():
        out_ref[...] = jnp.zeros_like(out_ref)

    fl = _focal_elementwise(p_ref[...], t_ref[...], alpha=alpha, gamma=gamma,
                            logits=logits, binary_targets=binary_targets)
    partial = fl.reshape(fl.shape[0] // _SUBLANES, _SUBLANES, fl.shape[1]).sum(axis=0)
    out_ref[...] += partial[None]


def _focal_elem_kernel(p_ref, t_ref, o_ref, *, alpha, gamma, logits,
                       binary_targets):
    o_ref[...] = _focal_elementwise(p_ref[...], t_ref[...], alpha=alpha,
                                    gamma=gamma, logits=logits,
                                    binary_targets=binary_targets)


def focal_loss(inputs, targets, alpha=1, gamma=2, logits=False, reduce=True,
               assume_binary_targets=False, max_tile_rows=512):
    """Focal loss forward on TPU via Pallas. inputs/targets: same shape/float dtype."""
    orig_shape = inputs.shape
    n = int(inputs.size)

    # ---- tiling plan: lane-dense (rows, 512) slab, ~1 MiB f32 input blocks ----
    rows = -(-n // _LANES)
    tile_rows = min(int(max_tile_rows), _round_up(rows, _SUBLANES))
    tile_rows = _round_up(tile_rows, _SUBLANES)
    if reduce and _round_up(rows, tile_rows) >= 2 * tile_rows:
        num_splits = 2          # engage both TensorCores on v7x (parallel axis)
    else:
        num_splits = 1
    rows_pad = _round_up(rows, num_splits * tile_rows)
    steps = rows_pad // (num_splits * tile_rows)

    # ---- pad flat stream with zero-loss elements (mean still divides by true n) ----
    pad = rows_pad * _LANES - n
    flat_p = inputs.reshape(-1)
    flat_t = targets.reshape(-1)
    if pad:
        # (x=200, t=1) for logits, (p=1, t=1) otherwise -> focal loss is exactly 0.
        pad_x = jnp.full((pad,), 200.0 if logits else 1.0, dtype=flat_p.dtype)
        pad_t = jnp.ones((pad,), dtype=flat_t.dtype)
        flat_p = jnp.concatenate([flat_p, pad_x])
        flat_t = jnp.concatenate([flat_t, pad_t])
    p2 = flat_p.reshape(rows_pad, _LANES)
    t2 = flat_t.reshape(rows_pad, _LANES)

    if reduce:
        kernel = functools.partial(
            _focal_sum_kernel, alpha=float(alpha), gamma=gamma, logits=logits,
            binary_targets=assume_binary_targets)
        in_spec = pl.BlockSpec((tile_rows, _LANES),
                               lambda c, j: (c * steps + j, 0))
        partials = pl.pallas_call(
            kernel,
            out_shape=jax.ShapeDtypeStruct((num_splits, _SUBLANES, _LANES),
                                           jnp.float32),
            grid_spec=pltpu.PrefetchScalarGridSpec(
                num_scalar_prefetch=0,
                grid=(num_splits, steps),
                in_specs=[in_spec, in_spec],
                out_specs=pl.BlockSpec((1, _SUBLANES, _LANES),
                                       lambda c, j: (c, 0, 0))),
            compiler_params=pltpu.CompilerParams(
                dimension_semantics=("parallel", "arbitrary"),
                vmem_limit_bytes=_VMEM_LIMIT),
        )(p2, t2)
        # Single cross-lane reduce + mean scaling (padding contributed exactly 0).
        return (jnp.sum(partials) * jnp.float32(1.0 / n)).astype(jnp.float32)

    kernel = functools.partial(
        _focal_elem_kernel, alpha=float(alpha), gamma=gamma, logits=logits,
        binary_targets=assume_binary_targets)
    spec = pl.BlockSpec((tile_rows, _LANES), lambda i: (i, 0))
    out = pl.pallas_call(
        kernel,
        out_shape=jax.ShapeDtypeStruct((rows_pad, _LANES), jnp.float32),
        grid_spec=pltpu.PrefetchScalarGridSpec(
            num_scalar_prefetch=0,
            grid=(rows_pad // tile_rows,),
            in_specs=[spec, spec],
            out_specs=pl.BlockSpec((tile_rows, _LANES), lambda i: (i, 0))),
        compiler_params=pltpu.CompilerParams(
            dimension_semantics=("parallel",),
            vmem_limit_bytes=_VMEM_LIMIT),
    )(p2, t2)
    out_flat = out.reshape(-1)
    if pad:
        out_flat = out_flat[:n]
    return out_flat.reshape(orig_shape)


def _focal_loss_ref(inputs, targets, alpha=1, gamma=2, logits=False, reduce=True):
    fl = _focal_elementwise(inputs, targets, alpha=float(alpha), gamma=gamma,
                            logits=logits, binary_targets=False)
    return jnp.mean(fl) if reduce else fl


if __name__ == "__main__":
    key = jax.random.PRNGKey(0)
    k_p, k_t = jax.random.split(key)

    # NCHW probabilities in (0, 1) and binary targets.
    shape = (2, 4, 16, 16)
    x = jax.random.uniform(k_p, shape, dtype=jnp.float32,
                           minval=1e-4, maxval=1.0 - 1e-4)
    t = jax.random.bernoulli(k_t, p=0.5, shape=shape).astype(jnp.float32)

    # Default FocalLoss(alpha=1, gamma=2, logits=False, reduce=True).
    out = jax.block_until_ready(focal_loss(x, t))
    ref = _focal_loss_ref(x, t)
    assert jnp.allclose(out, ref, rtol=1e-5, atol=1e-6), (out, ref)

    # reduce=False (elementwise) path.
    out_e = jax.block_until_ready(focal_loss(x, t, reduce=False))
    ref_e = _focal_loss_ref(x, t, reduce=False)
    assert jnp.allclose(out_e, ref_e, rtol=1e-5, atol=1e-6)

    # Binary-targets fast path (1 transcendental / element).
    out_b = jax.block_until_ready(focal_loss(x, t, assume_binary_targets=True))
    assert jnp.allclose(out_b, ref, rtol=1e-4, atol=1e-6), (out_b, ref)

    # Shape that is not a multiple of the tile (exercises zero-loss padding).
    shape2 = (3, 5, 7, 11)
    x2 = jax.random.uniform(k_p, shape2, dtype=jnp.float32,
                            minval=1e-4, maxval=1.0 - 1e-4)
    t2 = jax.random.bernoulli(k_t, p=0.5, shape=shape2).astype(jnp.float32)
    assert jnp.allclose(jax.block_until_ready(focal_loss(x2, t2)),
                        _focal_loss_ref(x2, t2), rtol=1e-5, atol=1e-6)
    assert jnp.allclose(jax.block_until_ready(focal_loss(x2, t2, reduce=False)),
                        _focal_loss_ref(x2, t2, reduce=False),
                        rtol=1e-5, atol=1e-6)

    # Medium shape with a small max_tile_rows to exercise the multi-step grid
    # and the 2-way "parallel" split (v7x dual-TensorCore reduction path).
    shape3 = (4, 8, 64, 64)
    x3 = jax.random.uniform(k_p, shape3, dtype=jnp.float32,
                            minval=1e-4, maxval=1.0 - 1e-4)
    t3 = jax.random.bernoulli(k_t, p=0.5, shape=shape3).astype(jnp.float32)
    assert jnp.allclose(
        jax.block_until_ready(focal_loss(x3, t3, max_tile_rows=64)),
        _focal_loss_ref(x3, t3), rtol=1e-4, atol=1e-6)
    assert jnp.allclose(
        jax.block_until_ready(focal_loss(x3, t3, reduce=False, max_tile_rows=64)),
        _focal_loss_ref(x3, t3, reduce=False), rtol=1e-5, atol=1e-6)

    print("KERNEL_OK")
</pallas_src>

<mosaic_0001>
module attributes {stable_mosaic.version = 11 : i64} {
  func.func @_focal_sum_kernel(%arg0: i32, %arg1: i32, %arg2: memref<8x512xf32, #tpu.memory_space<vmem>>, %arg3: memref<8x512xf32, #tpu.memory_space<vmem>>, %arg4: memref<1x8x512xf32, #tpu.memory_space<vmem>>) attributes {dimension_semantics = [#tpu.dimension_semantics<parallel>, #tpu.dimension_semantics<arbitrary>], iteration_bounds = array<i64: 1, 1>, scalar_prefetch = 0 : i64, scratch_operands = 0 : i64, tpu.core_type = #tpu.core_type<tc>, window_params = [{transform_indices = @transform_0, window_bounds = array<i64: 8, 512>}, {transform_indices = @transform_1, window_bounds = array<i64: 8, 512>}, {transform_indices = @transform_2, window_bounds = array<i64: 1, 8, 512>}]} {
    %c0_i32 = arith.constant 0 : i32
    %0 = arith.cmpi eq, %arg1, %c0_i32 : i32
    %1 = arith.extui %0 : i1 to i32
    %c0_i32_0 = arith.constant 0 : i32
    %2 = arith.cmpi ne, %1, %c0_i32_0 : i32
    scf.if %2 {
      %cst_18 = arith.constant 0.000000e+00 : f32
      %35 = vector.broadcast %cst_18 : f32 to vector<1x8x512xf32>
      %c0_19 = arith.constant 0 : index
      %c0_20 = arith.constant 0 : index
      %c0_21 = arith.constant 0 : index
      %36 = vector.load %arg4[%c0_19, %c0_20, %c0_21] : memref<1x8x512xf32, #tpu.memory_space<vmem>>, vector<1x8x512xf32>
      tpu.vector_store %arg4[%c0_19, %c0_20, %c0_21], %35 {strides = array<i32>} : memref<1x8x512xf32, #tpu.memory_space<vmem>>, vector<1x8x512xf32>,
    } else {
    }
    %c0 = arith.constant 0 : index
    %c0_1 = arith.constant 0 : index
    %3 = vector.load %arg2[%c0, %c0_1] : memref<8x512xf32, #tpu.memory_space<vmem>>, vector<8x512xf32>
    %c0_2 = arith.constant 0 : index
    %c0_3 = arith.constant 0 : index
    %4 = vector.load %arg3[%c0_2, %c0_3] : memref<8x512xf32, #tpu.memory_space<vmem>>, vector<8x512xf32>
    %5 = math.log %3 : vector<8x512xf32>
    %cst = arith.constant -1.000000e+02 : f32
    %6 = vector.broadcast %cst : f32 to vector<8x512xf32>
    %7 = arith.maximumf %5, %6 : vector<8x512xf32>
    %cst_4 = arith.constant 1.000000e+00 : f32
    %8 = vector.broadcast %cst_4 : f32 to vector<8x512xf32>
    %9 = arith.subf %8, %3 : vector<8x512xf32>
    %10 = math.log %9 : vector<8x512xf32>
    %cst_5 = arith.constant -1.000000e+02 : f32
    %11 = vector.broadcast %cst_5 : f32 to vector<8x512xf32>
    %12 = arith.maximumf %10, %11 : vector<8x512xf32>
    %13 = arith.mulf %4, %7 : vector<8x512xf32>
    %cst_6 = arith.constant 1.000000e+00 : f32
    %14 = vector.broadcast %cst_6 : f32 to vector<8x512xf32>
    %15 = arith.subf %14, %4 : vector<8x512xf32>
    %16 = arith.mulf %15, %12 : vector<8x512xf32>
    %17 = arith.addf %13, %16 : vector<8x512xf32>
    %cst_7 = arith.constant 0.000000e+00 : f32
    %18 = vector.broadcast %cst_7 : f32 to vector<8x512xf32>
    %19 = arith.subf %18, %17 : vector<8x512xf32>
    %cst_8 = arith.constant 0.000000e+00 : f32
    %20 = vector.broadcast %cst_8 : f32 to vector<8x512xf32>
    %21 = arith.subf %20, %19 : vector<8x512xf32>
    %22 = math.exp %21 : vector<8x512xf32>
    %cst_9 = arith.constant 1.000000e+00 : f32
    %23 = vector.broadcast %cst_9 : f32 to vector<8x512xf32>
    %24 = arith.subf %23, %22 : vector<8x512xf32>
    %25 = arith.mulf %24, %24 : vector<8x512xf32>
    %cst_10 = arith.constant 1.000000e+00 : f32
    %26 = vector.broadcast %cst_10 : f32 to vector<8x512xf32>
    %27 = arith.mulf %26, %25 : vector<8x512xf32>
    %28 = arith.mulf %27, %19 : vector<8x512xf32>
    %29 = vector.shape_cast %28 : vector<8x512xf32> to vector<1x8x512xf32>
    %cst_11 = arith.constant dense<0.000000e+00> : vector<8x512xf32>
    %30 = vector.multi_reduction <add>, %29, %cst_11 [0] : vector<1x8x512xf32> to vector<8x512xf32>
    %c0_12 = arith.constant 0 : index
    %c0_13 = arith.constant 0 : index
    %c0_14 = arith.constant 0 : index
    %31 = vector.load %arg4[%c0_12, %c0_13, %c0_14] : memref<1x8x512xf32, #tpu.memory_space<vmem>>, vector<1x8x512xf32>
    %32 = vector.shape_cast %30 : vector<8x512xf32> to vector<1x8x512xf32>
    %33 = arith.addf %31, %32 : vector<1x8x512xf32>
    %c0_15 = arith.constant 0 : index
    %c0_16 = arith.constant 0 : index
    %c0_17 = arith.constant 0 : index
    %34 = vector.load %arg4[%c0_15, %c0_16, %c0_17] : memref<1x8x512xf32, #tpu.memory_space<vmem>>, vector<1x8x512xf32>
    tpu.vector_store %arg4[%c0_15, %c0_16, %c0_17], %33 {strides = array<i32>} : memref<1x8x512xf32, #tpu.memory_space<vmem>>, vector<1x8x512xf32>,
    return
  }
  func.func @transform_0(%arg0: i32, %arg1: i32) -> (i32, i32) {
    %c1_i32 = arith.constant 1 : i32
    %0 = arith.muli %arg0, %c1_i32 : i32
    %1 = arith.addi %0, %arg1 : i32
    %c0_i32 = arith.constant 0 : i32
    %c0_i32_0 = arith.constant 0 : i32
    return %1, %c0_i32 : i32, i32
  }
  func.func @transform_1(%arg0: i32, %arg1: i32) -> (i32, i32) {
    %c1_i32 = arith.constant 1 : i32
    %0 = arith.muli %arg0, %c1_i32 : i32
    %1 = arith.addi %0, %arg1 : i32
    %c0_i32 = arith.constant 0 : i32
    %c0_i32_0 = arith.constant 0 : i32
    return %1, %c0_i32 : i32, i32
  }
  func.func @transform_2(%arg0: i32, %arg1: i32) -> (i32, i32, i32) {
    %c0_i32 = arith.constant 0 : i32
    %c0_i32_0 = arith.constant 0 : i32
    %c0_i32_1 = arith.constant 0 : i32
    return %arg0, %c0_i32, %c0_i32_0 : i32, i32, i32
  }
}

</mosaic_0001>

<bundles_post_ra>
// kernel: tpu_custom_call.1
= control target key start
LH: loop header
LB: loop body
LE: loop exit
PB: predicated region body
PF: predicated region fallthrough
CT: control target
= control target key end

     0   :  { %7 = vsyncpa [#allocation3], 0  ;;  %s305_s0 = inlined_call_operand.hbm [shape: f32[8,512], index: 0, kind: input, shape index: {}]   ;;  %s306_s1 = inlined_call_operand.hbm [shape: f32[8,512], index: 1, kind: input, shape index: {}]   ;;  %s307_s2 = inlined_call_operand.hbm [shape: f32[1,8,512], index: 2, kind: output, shape index: {}]  }
   0x1   :  { %8 = vsyncpa [#allocation6], 0 }
   0x2   :  { %9 = vsyncpa [#allocation4], 0  ;;  %s19_s11 = sshll.u32 %s305_s0, 4  ;;  %s278_s12 = smov [#allocation2]   ;;  %s20_s11 = int_to_ptr.hbm [resolvable:$true] %s19_s11 }
   0x3   :  { %s21_s13 = sshll.u32 %s278_s12, 4  ;;  %s34_s16 = sshll.u32 %s306_s1, 4  ;;  %s22_s13 = int_to_ptr.vmem [resolvable:$true] %s21_s13  ;;  %s35_s16 = int_to_ptr.hbm [resolvable:$true] %s34_s16 }
   0x4   :  { %24 = dma.hbm_to_vmem [thread:$0]  %s20_s11, 512, %s22_s13, [#allocation3]  }
   0x5   :  { %s279_s17 = smov [#allocation5]  }
   0x6   :  { %s36_s18 = sshll.u32 %s279_s17, 4  ;;  %s37_s18 = int_to_ptr.vmem [resolvable:$true] %s36_s18 }
   0x7   :  { %39 = dma.hbm_to_vmem [thread:$0]  %s35_s16, 512, %s37_s18, [#allocation6]  }
   0x8   :  { %272 = dma.done.wait [#allocation3], 512  }
   0x9   :  { %273 = vsyncadd [#allocation3], 4294966784 }
   0xa   :  { %274 = dma.done.wait [#allocation6], 512  }
   0xb   :  { %275 = vsyncadd [#allocation6], 4294966784  ;;  %v58_v0 = vld [vmem:[#allocation2] sm:$0xff]  ;;  %v59_v1 = vld [vmem:[#allocation2 + $0x8] sm:$0xff]  ;;  %s280_s0 = smov [#allocation7]   ;;  %s161_s21 = sshll.u32 %s307_s2, 4  ;;  %s162_s21 = int_to_ptr.hbm [resolvable:$true] %s161_s21 }
   0xc   :  { %176 = vlog2.f32 %v58_v0  ;;  %v78_v2 = vsub.f32 1.0, %v58_v0  ;;  %v79_v3 = vsub.f32 1.0, %v59_v1  ;;  %v60_v4 = vld [vmem:[#allocation2 + $0x10] sm:$0xff]  ;;  %v61_v6 = vld [vmem:[#allocation2 + $0x18] sm:$0xff]  ;;  %v62_v9 = vld [vmem:[#allocation5] sm:$0xff]  ;;  %s159_s1 = sshll.u32 %s280_s0, 4  ;;  %s160_s1 = int_to_ptr.vmem [resolvable:$true] %s159_s1 }
   0xd   :  { %178 = vlog2.f32 %v59_v1  ;;  %v80_v5 = vsub.f32 1.0, %v60_v4  ;;  %v81_v7 = vsub.f32 1.0, %v61_v6  ;;  %v63_v12 = vld [vmem:[#allocation5 + $0x8] sm:$0xff]  ;;  %v98_v18 = vsub.f32 1.0, %v62_v9  ;;  %v64_v19 = vld [vmem:[#allocation5 + $0x10] sm:$0xff]  ;;  %v65_v28 = vld [vmem:[#allocation5 + $0x18] sm:$0xff] }
   0xe   :  { %180 = vlog2.f32 %v78_v2  ;;  %v99_v23 = vsub.f32 1.0, %v63_v12  ;;  %v100_v33 = vsub.f32 1.0, %v64_v19  ;;  %v101_v41 = vsub.f32 1.0, %v65_v28 }
   0xf   :  { %182 = vlog2.f32 %v79_v3 }
  0x10   :  { %184 = vlog2.f32 %v60_v4 }
  0x11   :  { %186 = vlog2.f32 %v80_v5 }
  0x12   :  { %v177_v8 = vpop.eup %176  ;;  %188 = vlog2.f32 %v61_v6 }
  0x13   :  { %v179_v10 = vpop.eup %178  ;;  %v67_v11 = vmul.f32 0.6931472, %v177_v8  ;;  %190 = vlog2.f32 %v81_v7 }
  0x14   :  { %v181_v13 = vpop.eup %180  ;;  %v69_v14 = vmul.f32 0.6931472, %v179_v10 }
  0x15   :  { %v183_v15 = vpop.eup %182  ;;  %v74_v16 = vmax.f32 %v67_v11, -100.0  ;;  %v83_v17 = vmul.f32 0.6931472, %v181_v13 }
  0x16   :  { %v185_v20 = vpop.eup %184  ;;  %v75_v21 = vmax.f32 %v69_v14, -100.0  ;;  %v85_v22 = vmul.f32 0.6931472, %v183_v15 }
  0x17   :  { %v187_v24 = vpop.eup %186  ;;  %v90_v25 = vmax.f32 %v83_v17, -100.0  ;;  %v94_v26 = vmul.f32 %v74_v16, %v62_v9  ;;  %v71_v27 = vmul.f32 0.6931472, %v185_v20 }
  0x18   :  { %v189_v29 = vpop.eup %188  ;;  %v91_v30 = vmax.f32 %v85_v22, -100.0  ;;  %v95_v31 = vmul.f32 %v75_v21, %v63_v12  ;;  %v87_v32 = vmul.f32 0.6931472, %v187_v24 }
  0x19   :  { %v191_v34 = vpop.eup %190  ;;  %v102_v35 = vmul.f32 %v98_v18, %v90_v25  ;;  %v76_v36 = vmax.f32 %v71_v27, -100.0  ;;  %v73_v37 = vmul.f32 0.6931472, %v189_v29 }
  0x1a   :  { %v103_v38 = vmul.f32 %v99_v23, %v91_v30  ;;  %v92_v39 = vmax.f32 %v87_v32, -100.0  ;;  %v89_v40 = vmul.f32 0.6931472, %v191_v34 }
  0x1b   :  { %v106_v42 = vadd.f32 %v102_v35, %v94_v26  ;;  %v96_v43 = vmul.f32 %v76_v36, %v64_v19  ;;  %v77_v44 = vmax.f32 %v73_v37, -100.0 }
  0x1c   :  { %v107_v45 = vadd.f32 %v103_v38, %v95_v31  ;;  %v104_v46 = vmul.f32 %v100_v33, %v92_v39  ;;  %v93_v47 = vmax.f32 %v89_v40, -100.0 }
  0x1d   :  { %v110_v48 = vsub.f32 0.0, %v106_v42  ;;  %v97_v49 = vmul.f32 %v77_v44, %v65_v28 }
  0x1e   :  { %v111_v50 = vsub.f32 0.0, %v107_v45  ;;  %v108_v51 = vadd.f32 %v104_v46, %v96_v43  ;;  %v105_v52 = vmul.f32 %v101_v41, %v93_v47 }
  0x1f   :  { %v114_v53 = vsub.f32 0.0, %v110_v48 }
  0x20   :  { %v115_v54 = vsub.f32 0.0, %v111_v50  ;;  %v112_v55 = vsub.f32 0.0, %v108_v51  ;;  %v109_v56 = vadd.f32 %v105_v52, %v97_v49 }
  0x21   :  { %v118_v57 = vmul.f32 1.442695, %v114_v53 }
  0x22   :  { %v120_v58 = vmul.f32 1.442695, %v115_v54  ;;  %v116_v59 = vsub.f32 0.0, %v112_v55  ;;  %v113_v60 = vsub.f32 0.0, %v109_v56 }
  0x23   :  { %192 = vpow2.f32 %v118_v57 }
  0x24   :  { %194 = vpow2.f32 %v120_v58  ;;  %v122_v61 = vmul.f32 1.442695, %v116_v59  ;;  %v117_v62 = vsub.f32 0.0, %v113_v60 }
  0x26   :  { %196 = vpow2.f32 %v122_v61  ;;  %v124_v63 = vmul.f32 1.442695, %v117_v62 }
  0x28   :  { %198 = vpow2.f32 %v124_v63 }
  0x29   :  { %v193_v0 = vpop.eup %192 }
  0x2a   :  { %v195_v1 = vpop.eup %194  ;;  %v126_v2 = vsub.f32 1.0, %v193_v0 }
  0x2b   :  { %v127_v3 = vsub.f32 1.0, %v195_v1 }
  0x2c   :  { %v197_v4 = vpop.eup %196  ;;  %v130_v5 = vmul.f32 %v126_v2, %v126_v2 }
  0x2d   :  { %v131_v6 = vmul.f32 %v127_v3, %v127_v3  ;;  %v128_v7 = vsub.f32 1.0, %v197_v4 }
  0x2e   :  { %v199_v8 = vpop.eup %198  ;;  %v134_v9 = vmul.f32 %v130_v5, %v110_v48 }
  0x2f   :  { %v135_v10 = vmul.f32 %v131_v6, %v111_v50  ;;  %v132_v11 = vmul.f32 %v128_v7, %v128_v7  ;;  %v129_v12 = vsub.f32 1.0, %v199_v8 }
  0x30   :  { %150 = vst [vmem:[#allocation7] sm:$0xff] %v134_v9 }
  0x31   :  { %v136_v13 = vmul.f32 %v132_v11, %v112_v55  ;;  %v133_v14 = vmul.f32 %v129_v12, %v129_v12  ;;  %151 = vst [vmem:[#allocation7 + $0x8] sm:$0xff] %v135_v10 }
  0x33   :  { %v137_v15 = vmul.f32 %v133_v14, %v113_v60  ;;  %152 = vst [vmem:[#allocation7 + $0x10] sm:$0xff] %v136_v13 }
  0x35   :  { %153 = vst [vmem:[#allocation7 + $0x18] sm:$0xff] %v137_v15 }
  0x36   :  { %164 = dma.vmem_to_hbm [thread:$0]  %s160_s1, 512, %s162_s21, [#allocation4]  }
  0x37   :  { %276 = dma.done.wait [#allocation4], 512  }
  0x38   :  { %277 = vsyncadd [#allocation4], 4294966784 }
  0x39   :  { %169 = vsyncpa [#allocation3], 1 }
  0x3a   :  { %170 = vsyncpa [#allocation6], 1 }
  0x3b   :  { %171 = vsyncpa [#allocation4], 1 }

</bundles_post_ra>
